<compile_context>
chip_gen: v7x
topology: tpu7x:2x2x1
jax: 0.10.0
libtpu: 0.0.40
codegen_flags: <defaults>
</compile_context>

<pallas_src>
import functools

import jax
import jax.numpy as jnp
from jax.experimental import pallas as pl
from jax.experimental.pallas import tpu as pltpu

KERNEL_SIZES = (32, 64, 128, 256)
# cumulative left-rolls applied to x before each conv in the PyTorch forward
SHIFTS = (0, 64, 192, 448)
SPAN = SHIFTS[-1] + KERNEL_SIZES[-1]      # 704: receptive field of one output sample


def _round_up(v, m):
    return ((v + m - 1) // m) * m


def _filterbank_kernel(x_ref, w_ref, o_ref, *, t_blk, q_steps):
    """One (batch, time-block) tile.

    x_ref: (1, n_steps, stride)  phase-decimated signal (compute dtype)
    w_ref: (Q, stride, C)        fused, zero-padded filter bank (compute dtype)
    o_ref: (1, C, t_blk)         NCW output block (lane-dense store)
    """
    tw = t_blk + q_steps - 1
    t0 = pl.multiple_of(pl.program_id(1) * t_blk, t_blk)     # sublane-aligned window start
    xwin = x_ref[0, pl.ds(t0, tw), :]                         # (TW, stride)

    c_out = o_ref.shape[1]
    acc = jnp.zeros((t_blk, c_out), jnp.float32)
    for q in range(q_steps):                                  # short static loop (Q <= 11)
        # (TW, stride) @ (stride, C) on the MXU, f32 accumulation.
        r = jnp.dot(xwin, w_ref[q], preferred_element_type=jnp.float32)
        acc = acc + r[q:q + t_blk, :]                         # cheap sublane-shifted slice of (TW, C)
    # channels on sublanes, time on lanes -> full-tile NCW store, no wrapper transpose.
    o_ref[0] = jnp.transpose(acc, (1, 0)).astype(o_ref.dtype)


def filterbank_conv1d(x, weights, *, stride, compute_dtype=jnp.float32):
    """Pallas equivalent of FilterBankConv1d.forward.

    x: (B, 1, L) float32 (PyTorch NCW).
    weights: 4 arrays of shape (n_filters, 1, K_j), K_j in (32, 64, 128, 256).
    Returns (B, 4*n_filters, out_len), identical to the PyTorch module.
    """
    B, C_in, L = x.shape
    assert C_in == 1
    n_filters = weights[0].shape[0]
    c_out = 4 * n_filters
    out_len = (L - KERNEL_SIZES[0]) // stride + 1 - 4          # out1.shape[2] - 4
    assert out_len >= 1, "input too short for this stride"

    q_steps = -(-SPAN // stride)                               # ceil(704 / stride)
    t_blk = min(128, _round_up(out_len, 8))                    # output lane tile
    out_pad = _round_up(out_len, t_blk)
    n_tblk = out_pad // t_blk
    n_steps = out_pad + q_steps                                # decimated steps kept resident
    l_pad = n_steps * stride

    # Wraparound prefix so the rolled convs become contiguous reads (single wrap),
    # then zero-pad / truncate to exactly n_steps*stride samples.
    max_idx = (out_len - 1) * stride + SPAN
    ext = max(0, max_idx - L)
    assert ext <= L, "single-wrap assumption violated (signal too short)"
    x2 = x[:, 0, :]
    x_src = jnp.concatenate([x2, x2[:, :ext]], axis=1) if ext > 0 else x2
    cur = x_src.shape[1]
    if cur >= l_pad:
        x_full = x_src[:, :l_pad]
    else:
        x_full = jnp.pad(x_src, ((0, 0), (0, l_pad - cur)))
    # Phase decimation: X[b, t, r] = x_ext[b, t*stride + r] (pure reshape, no transpose).
    x_dec = x_full.reshape(B, n_steps, stride).astype(compute_dtype)

    # Fused, zero-padded weight bank: W[shift_j + k, j*nf + f] = w_j[f, 0, k].
    w_flat = jnp.zeros((q_steps * stride, c_out), jnp.float32)
    for j, (w, ksz, shift) in enumerate(zip(weights, KERNEL_SIZES, SHIFTS)):
        w_flat = w_flat.at[shift:shift + ksz, j * n_filters:(j + 1) * n_filters].set(
            jnp.transpose(w[:, 0, :].astype(jnp.float32), (1, 0)))
    w_pack = w_flat.reshape(q_steps, stride, c_out).astype(compute_dtype)

    kernel = functools.partial(_filterbank_kernel, t_blk=t_blk, q_steps=q_steps)

    itemsize = jnp.finfo(compute_dtype).bits // 8
    flops = 2 * B * out_len * sum(KERNEL_SIZES) * n_filters
    bytes_accessed = (x_dec.size * itemsize + w_pack.size * itemsize
                      + B * c_out * out_pad * 4)
    cost = pl.CostEstimate(flops=flops, transcendentals=0,
                           bytes_accessed=bytes_accessed)

    vmem_need = (2 * n_steps * stride * itemsize               # double-buffered x block
                 + 2 * c_out * t_blk * 4                       # double-buffered out block
                 + 2 * q_steps * stride * c_out * itemsize     # weights
                 + 2 * (t_blk + q_steps) * stride * itemsize   # in-kernel temporaries
                 + (4 << 20))                                  # headroom
    vmem_limit = int(min(64 << 20, max(16 << 20, vmem_need)))  # keep under v7x's 64 MiB

    out_padded = pl.pallas_call(
        kernel,
        out_shape=jax.ShapeDtypeStruct((B, c_out, out_pad), jnp.float32),
        grid=(B, n_tblk),
        in_specs=[
            pl.BlockSpec((1, n_steps, stride), lambda b, t: (b, 0, 0)),
            pl.BlockSpec((q_steps, stride, c_out), lambda b, t: (0, 0, 0)),
        ],
        out_specs=pl.BlockSpec((1, c_out, t_blk), lambda b, t: (b, 0, t)),
        compiler_params=pltpu.CompilerParams(
            dimension_semantics=("parallel", "parallel"),
            vmem_limit_bytes=vmem_limit),
        cost_estimate=cost,
    )(x_dec, w_pack)

    # already NCW; just drop padded time positions (no transpose).
    return out_padded[:, :, :out_len] if out_pad != out_len else out_padded


def ref_forward(x, weights, *, stride):
    """Pure-JAX reference mirroring the PyTorch forward (roll + strided valid conv)."""
    xs = x[:, 0, :]
    _, L = xs.shape
    out_len = (L - KERNEL_SIZES[0]) // stride + 1 - 4
    outs = []
    for w, k, shift in zip(weights, KERNEL_SIZES, SHIFTS):
        xr = jnp.roll(xs, -shift, axis=1)
        t_out = (L - k) // stride + 1
        idx = jnp.arange(t_out)[:, None] * stride + jnp.arange(k)[None, :]
        patches = xr[:, idx]                                   # (B, T, K)
        o = jnp.einsum('btk,fk->bft', patches, w[:, 0, :])
        outs.append(o[:, :, :out_len])
    return jnp.concatenate(outs, axis=1)


if __name__ == "__main__":
    key = jax.random.PRNGKey(0)
    B = 2
    n_filters = 2
    stride = 64    # stride_res (the default 320 would need L >= 1312; keep shapes small)
    L = 512

    kx, k32, k64, k128, k256 = jax.random.split(key, 5)
    x = jax.random.normal(kx, (B, 1, L), dtype=jnp.float32)

    weights = []
    for k_sz, kk in zip(KERNEL_SIZES, (k32, k64, k128, k256)):
        bound = 1.0 / (k_sz ** 0.5)   # PyTorch Conv1d default init range (fan_in = 1*K)
        weights.append(jax.random.uniform(kk, (n_filters, 1, k_sz),
                                          minval=-bound, maxval=bound,
                                          dtype=jnp.float32))

    ref = ref_forward(x, weights, stride=stride)
    expected_shape = (B, 4 * n_filters, (L - 32) // stride + 1 - 4)

    # f32 path: matches the PyTorch module numerics.
    out_f32 = jax.block_until_ready(filterbank_conv1d(x, weights, stride=stride))
    assert out_f32.shape == expected_shape, (out_f32.shape, expected_shape)
    assert jnp.allclose(out_f32, ref, atol=2e-4, rtol=2e-4), \
        float(jnp.max(jnp.abs(out_f32 - ref)))

    # bf16 path: MXU-native inputs on v6e/v7x, f32 accumulation.
    out_bf16 = jax.block_until_ready(
        filterbank_conv1d(x, weights, stride=stride, compute_dtype=jnp.bfloat16))
    assert out_bf16.shape == expected_shape, (out_bf16.shape, expected_shape)
    assert jnp.allclose(out_bf16, ref, atol=5e-2, rtol=5e-2), \
        float(jnp.max(jnp.abs(out_bf16 - ref)))

    print("KERNEL_OK")
</pallas_src>

<mosaic_0001>
module attributes {stable_mosaic.version = 11 : i64} {
  func.func @_filterbank_kernel(%arg0: i32, %arg1: i32, %arg2: memref<1x19x64xf32, #tpu.memory_space<vmem>>, %arg3: memref<11x64x8xf32, #tpu.memory_space<vmem>>, %arg4: memref<1x8x8xf32, #tpu.memory_space<vmem>>) attributes {dimension_semantics = [#tpu.dimension_semantics<parallel>, #tpu.dimension_semantics<parallel>], iteration_bounds = array<i64: 2, 1>, scalar_prefetch = 0 : i64, scratch_operands = 0 : i64, tpu.core_type = #tpu.core_type<tc>, window_params = [{transform_indices = @transform_0, window_bounds = array<i64: 1, 19, 64>}, {pipeline_mode = #tpu.pipeline_mode<synchronous>, transform_indices = @transform_1, window_bounds = array<i64: 11, 64, 8>}, {transform_indices = @transform_2, window_bounds = array<i64: 1, 8, 8>}]} {
    %c8_i32 = arith.constant 8 : i32
    %0 = arith.muli %arg1, %c8_i32 : i32
    %1 = tpu.assume_multiple %0, 8 : i32
    %c0 = arith.constant 0 : index
    %2 = arith.index_cast %1 : i32 to index
    %c0_0 = arith.constant 0 : index
    %3 = vector.load %arg2[%c0, %2, %c0_0] : memref<1x19x64xf32, #tpu.memory_space<vmem>>, vector<1x18x64xf32>
    %4 = vector.shape_cast %3 : vector<1x18x64xf32> to vector<18x64xf32>
    %cst = arith.constant 0.000000e+00 : f32
    %5 = vector.broadcast %cst : f32 to vector<8x8xf32>
    %c0_1 = arith.constant 0 : index
    %c0_2 = arith.constant 0 : index
    %c0_3 = arith.constant 0 : index
    %6 = vector.load %arg3[%c0_1, %c0_2, %c0_3] : memref<11x64x8xf32, #tpu.memory_space<vmem>>, vector<1x64x8xf32>
    %7 = vector.shape_cast %6 : vector<1x64x8xf32> to vector<64x8xf32>
    %cst_4 = arith.constant dense<0.000000e+00> : vector<18x8xf32>
    %8 = tpu.matmul %4, %7, %cst_4 {dimension_numbers = #tpu.dot_dimension_numbers<[1], [0], [0], [1], [0, 0, 1, 1], [], []>} : vector<18x64xf32>, vector<64x8xf32>, vector<18x8xf32> -> vector<18x8xf32>
    %9 = vector.extract_strided_slice %8 {offsets = [0, 0], sizes = [8, 8], strides = [1, 1]} : vector<18x8xf32> to vector<8x8xf32>
    %10 = arith.addf %5, %9 : vector<8x8xf32>
    %c1 = arith.constant 1 : index
    %c0_5 = arith.constant 0 : index
    %c0_6 = arith.constant 0 : index
    %11 = vector.load %arg3[%c1, %c0_5, %c0_6] : memref<11x64x8xf32, #tpu.memory_space<vmem>>, vector<1x64x8xf32>
    %12 = vector.shape_cast %11 : vector<1x64x8xf32> to vector<64x8xf32>
    %cst_7 = arith.constant dense<0.000000e+00> : vector<18x8xf32>
    %13 = tpu.matmul %4, %12, %cst_7 {dimension_numbers = #tpu.dot_dimension_numbers<[1], [0], [0], [1], [0, 0, 1, 1], [], []>} : vector<18x64xf32>, vector<64x8xf32>, vector<18x8xf32> -> vector<18x8xf32>
    %14 = vector.extract_strided_slice %13 {offsets = [1, 0], sizes = [8, 8], strides = [1, 1]} : vector<18x8xf32> to vector<8x8xf32>
    %15 = arith.addf %10, %14 : vector<8x8xf32>
    %c2 = arith.constant 2 : index
    %c0_8 = arith.constant 0 : index
    %c0_9 = arith.constant 0 : index
    %16 = vector.load %arg3[%c2, %c0_8, %c0_9] : memref<11x64x8xf32, #tpu.memory_space<vmem>>, vector<1x64x8xf32>
    %17 = vector.shape_cast %16 : vector<1x64x8xf32> to vector<64x8xf32>
    %cst_10 = arith.constant dense<0.000000e+00> : vector<18x8xf32>
    %18 = tpu.matmul %4, %17, %cst_10 {dimension_numbers = #tpu.dot_dimension_numbers<[1], [0], [0], [1], [0, 0, 1, 1], [], []>} : vector<18x64xf32>, vector<64x8xf32>, vector<18x8xf32> -> vector<18x8xf32>
    %19 = vector.extract_strided_slice %18 {offsets = [2, 0], sizes = [8, 8], strides = [1, 1]} : vector<18x8xf32> to vector<8x8xf32>
    %20 = arith.addf %15, %19 : vector<8x8xf32>
    %c3 = arith.constant 3 : index
    %c0_11 = arith.constant 0 : index
    %c0_12 = arith.constant 0 : index
    %21 = vector.load %arg3[%c3, %c0_11, %c0_12] : memref<11x64x8xf32, #tpu.memory_space<vmem>>, vector<1x64x8xf32>
    %22 = vector.shape_cast %21 : vector<1x64x8xf32> to vector<64x8xf32>
    %cst_13 = arith.constant dense<0.000000e+00> : vector<18x8xf32>
    %23 = tpu.matmul %4, %22, %cst_13 {dimension_numbers = #tpu.dot_dimension_numbers<[1], [0], [0], [1], [0, 0, 1, 1], [], []>} : vector<18x64xf32>, vector<64x8xf32>, vector<18x8xf32> -> vector<18x8xf32>
    %24 = vector.extract_strided_slice %23 {offsets = [3, 0], sizes = [8, 8], strides = [1, 1]} : vector<18x8xf32> to vector<8x8xf32>
    %25 = arith.addf %20, %24 : vector<8x8xf32>
    %c4 = arith.constant 4 : index
    %c0_14 = arith.constant 0 : index
    %c0_15 = arith.constant 0 : index
    %26 = vector.load %arg3[%c4, %c0_14, %c0_15] : memref<11x64x8xf32, #tpu.memory_space<vmem>>, vector<1x64x8xf32>
    %27 = vector.shape_cast %26 : vector<1x64x8xf32> to vector<64x8xf32>
    %cst_16 = arith.constant dense<0.000000e+00> : vector<18x8xf32>
    %28 = tpu.matmul %4, %27, %cst_16 {dimension_numbers = #tpu.dot_dimension_numbers<[1], [0], [0], [1], [0, 0, 1, 1], [], []>} : vector<18x64xf32>, vector<64x8xf32>, vector<18x8xf32> -> vector<18x8xf32>
    %29 = vector.extract_strided_slice %28 {offsets = [4, 0], sizes = [8, 8], strides = [1, 1]} : vector<18x8xf32> to vector<8x8xf32>
    %30 = arith.addf %25, %29 : vector<8x8xf32>
    %c5 = arith.constant 5 : index
    %c0_17 = arith.constant 0 : index
    %c0_18 = arith.constant 0 : index
    %31 = vector.load %arg3[%c5, %c0_17, %c0_18] : memref<11x64x8xf32, #tpu.memory_space<vmem>>, vector<1x64x8xf32>
    %32 = vector.shape_cast %31 : vector<1x64x8xf32> to vector<64x8xf32>
    %cst_19 = arith.constant dense<0.000000e+00> : vector<18x8xf32>
    %33 = tpu.matmul %4, %32, %cst_19 {dimension_numbers = #tpu.dot_dimension_numbers<[1], [0], [0], [1], [0, 0, 1, 1], [], []>} : vector<18x64xf32>, vector<64x8xf32>, vector<18x8xf32> -> vector<18x8xf32>
    %34 = vector.extract_strided_slice %33 {offsets = [5, 0], sizes = [8, 8], strides = [1, 1]} : vector<18x8xf32> to vector<8x8xf32>
    %35 = arith.addf %30, %34 : vector<8x8xf32>
    %c6 = arith.constant 6 : index
    %c0_20 = arith.constant 0 : index
    %c0_21 = arith.constant 0 : index
    %36 = vector.load %arg3[%c6, %c0_20, %c0_21] : memref<11x64x8xf32, #tpu.memory_space<vmem>>, vector<1x64x8xf32>
    %37 = vector.shape_cast %36 : vector<1x64x8xf32> to vector<64x8xf32>
    %cst_22 = arith.constant dense<0.000000e+00> : vector<18x8xf32>
    %38 = tpu.matmul %4, %37, %cst_22 {dimension_numbers = #tpu.dot_dimension_numbers<[1], [0], [0], [1], [0, 0, 1, 1], [], []>} : vector<18x64xf32>, vector<64x8xf32>, vector<18x8xf32> -> vector<18x8xf32>
    %39 = vector.extract_strided_slice %38 {offsets = [6, 0], sizes = [8, 8], strides = [1, 1]} : vector<18x8xf32> to vector<8x8xf32>
    %40 = arith.addf %35, %39 : vector<8x8xf32>
    %c7 = arith.constant 7 : index
    %c0_23 = arith.constant 0 : index
    %c0_24 = arith.constant 0 : index
    %41 = vector.load %arg3[%c7, %c0_23, %c0_24] : memref<11x64x8xf32, #tpu.memory_space<vmem>>, vector<1x64x8xf32>
    %42 = vector.shape_cast %41 : vector<1x64x8xf32> to vector<64x8xf32>
    %cst_25 = arith.constant dense<0.000000e+00> : vector<18x8xf32>
    %43 = tpu.matmul %4, %42, %cst_25 {dimension_numbers = #tpu.dot_dimension_numbers<[1], [0], [0], [1], [0, 0, 1, 1], [], []>} : vector<18x64xf32>, vector<64x8xf32>, vector<18x8xf32> -> vector<18x8xf32>
    %44 = vector.extract_strided_slice %43 {offsets = [7, 0], sizes = [8, 8], strides = [1, 1]} : vector<18x8xf32> to vector<8x8xf32>
    %45 = arith.addf %40, %44 : vector<8x8xf32>
    %c8 = arith.constant 8 : index
    %c0_26 = arith.constant 0 : index
    %c0_27 = arith.constant 0 : index
    %46 = vector.load %arg3[%c8, %c0_26, %c0_27] : memref<11x64x8xf32, #tpu.memory_space<vmem>>, vector<1x64x8xf32>
    %47 = vector.shape_cast %46 : vector<1x64x8xf32> to vector<64x8xf32>
    %cst_28 = arith.constant dense<0.000000e+00> : vector<18x8xf32>
    %48 = tpu.matmul %4, %47, %cst_28 {dimension_numbers = #tpu.dot_dimension_numbers<[1], [0], [0], [1], [0, 0, 1, 1], [], []>} : vector<18x64xf32>, vector<64x8xf32>, vector<18x8xf32> -> vector<18x8xf32>
    %49 = vector.extract_strided_slice %48 {offsets = [8, 0], sizes = [8, 8], strides = [1, 1]} : vector<18x8xf32> to vector<8x8xf32>
    %50 = arith.addf %45, %49 : vector<8x8xf32>
    %c9 = arith.constant 9 : index
    %c0_29 = arith.constant 0 : index
    %c0_30 = arith.constant 0 : index
    %51 = vector.load %arg3[%c9, %c0_29, %c0_30] : memref<11x64x8xf32, #tpu.memory_space<vmem>>, vector<1x64x8xf32>
    %52 = vector.shape_cast %51 : vector<1x64x8xf32> to vector<64x8xf32>
    %cst_31 = arith.constant dense<0.000000e+00> : vector<18x8xf32>
    %53 = tpu.matmul %4, %52, %cst_31 {dimension_numbers = #tpu.dot_dimension_numbers<[1], [0], [0], [1], [0, 0, 1, 1], [], []>} : vector<18x64xf32>, vector<64x8xf32>, vector<18x8xf32> -> vector<18x8xf32>
    %54 = vector.extract_strided_slice %53 {offsets = [9, 0], sizes = [8, 8], strides = [1, 1]} : vector<18x8xf32> to vector<8x8xf32>
    %55 = arith.addf %50, %54 : vector<8x8xf32>
    %c10 = arith.constant 10 : index
    %c0_32 = arith.constant 0 : index
    %c0_33 = arith.constant 0 : index
    %56 = vector.load %arg3[%c10, %c0_32, %c0_33] : memref<11x64x8xf32, #tpu.memory_space<vmem>>, vector<1x64x8xf32>
    %57 = vector.shape_cast %56 : vector<1x64x8xf32> to vector<64x8xf32>
    %cst_34 = arith.constant dense<0.000000e+00> : vector<18x8xf32>
    %58 = tpu.matmul %4, %57, %cst_34 {dimension_numbers = #tpu.dot_dimension_numbers<[1], [0], [0], [1], [0, 0, 1, 1], [], []>} : vector<18x64xf32>, vector<64x8xf32>, vector<18x8xf32> -> vector<18x8xf32>
    %59 = vector.extract_strided_slice %58 {offsets = [10, 0], sizes = [8, 8], strides = [1, 1]} : vector<18x8xf32> to vector<8x8xf32>
    %60 = arith.addf %55, %59 : vector<8x8xf32>
    %61 = tpu.transpose %60, [1, 0] : vector<8x8xf32> -> vector<8x8xf32>
    %c0_35 = arith.constant 0 : index
    %c0_36 = arith.constant 0 : index
    %c0_37 = arith.constant 0 : index
    %62 = vector.load %arg4[%c0_35, %c0_36, %c0_37] : memref<1x8x8xf32, #tpu.memory_space<vmem>>, vector<1x8x8xf32>
    %63 = vector.shape_cast %62 : vector<1x8x8xf32> to vector<8x8xf32>
    %64 = vector.shape_cast %61 : vector<8x8xf32> to vector<1x8x8xf32>
    tpu.vector_store %arg4[%c0_35, %c0_36, %c0_37], %64 {strides = array<i32>} : memref<1x8x8xf32, #tpu.memory_space<vmem>>, vector<1x8x8xf32>,
    return
  }
  func.func @transform_0(%arg0: i32, %arg1: i32) -> (i32, i32, i32) {
    %c0_i32 = arith.constant 0 : i32
    %c0_i32_0 = arith.constant 0 : i32
    %c0_i32_1 = arith.constant 0 : i32
    return %arg0, %c0_i32, %c0_i32_0 : i32, i32, i32
  }
  func.func @transform_1(%arg0: i32, %arg1: i32) -> (i32, i32, i32) {
    %c0_i32 = arith.constant 0 : i32
    %c0_i32_0 = arith.constant 0 : i32
    %c0_i32_1 = arith.constant 0 : i32
    %c0_i32_2 = arith.constant 0 : i32
    return %c0_i32, %c0_i32_0, %c0_i32_1 : i32, i32, i32
  }
  func.func @transform_2(%arg0: i32, %arg1: i32) -> (i32, i32, i32) {
    %c0_i32 = arith.constant 0 : i32
    %c0_i32_0 = arith.constant 0 : i32
    return %arg0, %c0_i32, %arg1 : i32, i32, i32
  }
}

</mosaic_0001>

<bundles_post_ra>
// kernel: tpu_custom_call.1
= control target key start
LH: loop header
LB: loop body
LE: loop exit
PB: predicated region body
PF: predicated region fallthrough
CT: control target
= control target key end

     0   :  { %7 = vsyncpa [#allocation3], 0  ;;  %s2718_s0 = inlined_call_operand.vmem [shape: f32[2,19,64], index: 0, kind: input, shape index: {}]   ;;  %s2719_s1 = inlined_call_operand.vmem [shape: f32[11,64,8], index: 1, kind: input, shape index: {}]   ;;  %s2720_s2 = inlined_call_operand.hbm [shape: f32[2,8,8], index: 2, kind: output, shape index: {}]  }
   0x1   :  { %9 = vsyncpa [#allocation3 + $0x1], 0  ;;  %s2145_s9 = smov 0   ;;  %s2147_s10 = smov 0  }
   0x2   :  { %s2149_s11 = smov 0   ;;  %s2151_s12 = smov 0  }
   0x3   :  { %s2153_s13 = smov 0   ;;  %s2155_s14 = smov 0  }
   0x4 LB: > { %s1327_s15 = sadd.s32 4294967295, %s2124_s14   ;;  %s1328_s16 = sadd.s32 4294967294, %s2124_s14   ;;  %s2124_s14 = sphi %s2155_s14, %s15_s14   ;;  %s2120_s13 = sphi %s2153_s13, %s2727_s13   ;;  %s2116_s12 = sphi %s2151_s12, %s2726_s12   ;;  %s2112_s11 = sphi %s2149_s11, %s2725_s11   ;;  %s2108_s10 = sphi %s2147_s10, %s2724_s10   ;;  %s2104_s9 = sphi %s2145_s9, %s2723_s9  }
   0x5   : > { %s27_s17 = sadd.s32 1, %s2120_s13  ;;  %s83_s18 = sadd.s32 1, %s2112_s11 }
   0x6   : > { %p29_p0 = scmp.ge.s32.totalorder %s27_s17, 2  ;;  %p93_p1 = scmp.ne.s32.totalorder %s2112_s11, %s2108_s10 }
   0x7   : > { %p94_p2 = scmp.eq.s32.totalorder %s1327_s15, 1  ;;  %p99_p3 = scmp.ne.s32.totalorder %s2108_s10, %s2104_s9 }
   0x8   : > { %s2729_s17 = smov (%p29_p0, %s27_s17), 0  ;;  %p100_p5 = scmp.eq.s32.totalorder %s1328_s16, 1 }
   0x9   : > { %p2185_p4 = por %p94_p2, %p93_p1  ;;  %s78_s20 = ssub.s32 %s2120_s13, %s2729_s17 }
   0xa   : > { %p1331_p6 = scmp.ge.s32.totalorder %s2124_s14, 1  ;;  %p81_p7 = scmp.eq.s32.totalorder %s78_s20, 0 }
   0xb   : > { %p2192_p8 = por %p100_p5, %p99_p3  ;;  %p129_p9 = scmp.lt.s32.totalorder %s2124_s14, 3 }
   0xc   : > { %s2198_s22 = scalar_select %p81_p7, %s2112_s11, %s83_s18  }
   0xd   : > { %p130_p10 = pnand %p1331_p6, %p129_p9 }
   0xe   : > { %v161_v0 = vld [vmem:[%s2719_s1] sm:$0xff] (!%p130_p10)  ;;  %v162_v1 = vld [vmem:[%s2719_s1 + $0x8] sm:$0xff] (!%p130_p10)  ;;  %v2126_v3 = vmov (!%p130_p10), 0.0|0.0   ;;  %v163_v6 = vld [vmem:[%s2719_s1 + $0x10] sm:$0xff] (!%p130_p10)  ;;  %p151_p11 = scmp.lt.s32.totalorder (!%p130_p10), %s2116_s12, 1  ;;  %vm2127_vm0 = vmmov (!%p130_p10), 0  }
   0xf   : > { %133 = sbr.rel (%p130_p10) target bundleno = 477 (0x1dd), region = 28  ;;  %v1337_v2 = vld [vmem:[%s2719_s1 + $0x40] sm:$0xff] (!%p130_p10)  ;;  %1847 = vmatprep.subr.bf16.mxu0 (!%p130_p10), %v2126_v3  ;;  %1859 = vmatprep.subr.bf16.mxu1 (!%p130_p10), %v2126_v3  ;;  %v1848_v4 = vpack.c.bf16 (!%p130_p10), %v162_v1, %v161_v0  ;;  %v1338_v5 = vld [vmem:[%s2719_s1 + $0x48] sm:$0xff] (!%p130_p10)  ;;  %v164_v7 = vld [vmem:[%s2719_s1 + $0x18] sm:$0xff] (!%p130_p10)  ;;  %v2128_v11 = vmov (!%p130_p10), 0.0   ;;  %vm169_vm1 = vcmask (!%p130_p10), 523264  }
  0x10   : > { %v1860_v8 = vpack.c.bf16 (!%p130_p10), %v1338_v5, %v1337_v2  ;;  %v1339_v9 = vld [vmem:[%s2719_s1 + $0x50] sm:$0xff] (!%p130_p10)  ;;  %v1340_v10 = vld [vmem:[%s2719_s1 + $0x58] sm:$0xff] (!%p130_p10)  ;;  %1613 = vmatprep.mubr.msk.f32.mxu1 (!%p130_p10), %vm2127_vm0, %v2128_v11  ;;  %1588 = vmatprep.mubr.msk.f32.mxu0 (!%p130_p10), %vm2127_vm0, %v2128_v11  ;;  %v1851_v12 = vpack.c.bf16 (!%p130_p10), %v164_v7, %v163_v6  ;;  %v165_v14 = vld [vmem:[%s2719_s1 + $0x20] sm:$0xff] (!%p130_p10)  ;;  %vm348_vm2 = vcmask (!%p130_p10), 1046528   ;;  %vm444_vm3 = vcmask (!%p130_p10), 1045504   ;;  %s1448_s27 = sshll.u32 (!%p130_p10), %s2116_s12, 7 }
  0x11   : > { %1849 = vmatpush3.bf16.msra.mxu0 (!%p130_p10), %v1848_v4  ;;  %v1863_v13 = vpack.c.bf16 (!%p130_p10), %v1340_v10, %v1339_v9  ;;  %v166_v15 = vld [vmem:[%s2719_s1 + $0x28] sm:$0xff] (!%p130_p10)  ;;  %v1341_v16 = vld [vmem:[%s2719_s1 + $0x60] sm:$0xff] (!%p130_p10)  ;;  %v167_v20 = vld [vmem:[%s2719_s1 + $0x30] sm:$0xff] (!%p130_p10)  ;;  %vm540_vm4 = vcmask (!%p130_p10), 1044480   ;;  %vm636_vm5 = vcmask (!%p130_p10), 1043456   ;;  %vm732_vm6 = vcmask (!%p130_p10), 1042432   ;;  %s2671_s4 = scalar_lea.hbm (!%p130_p10), %s2720_s2, %s1448_s27 }
  0x12   : > { %1861 = vmatpush3.bf16.msra.mxu1 (!%p130_p10), %v1860_v8  ;;  %1850 = vmatprep.subr.bf16.mxu0 (!%p130_p10), %v2126_v3  ;;  %v1342_v17 = vld [vmem:[%s2719_s1 + $0x68] sm:$0xff] (!%p130_p10)  ;;  %v1854_v18 = vpack.c.bf16 (!%p130_p10), %v166_v15, %v165_v14  ;;  %v168_v21 = vld [vmem:[%s2719_s1 + $0x38] sm:$0xff] (!%p130_p10)  ;;  %v1343_v22 = vld [vmem:[%s2719_s1 + $0x70] sm:$0xff] (!%p130_p10)  ;;  %vm828_vm7 = vcmask (!%p130_p10), 1041408   ;;  %vm924_vm8 = vcmask (!%p130_p10), 1040384   ;;  %vm1240_vm9 = vcmask (!%p130_p10), 64512  }
  0x13   : > { %1862 = vmatprep.subr.bf16.mxu1 (!%p130_p10), %v2126_v3  ;;  %v1866_v19 = vpack.c.bf16 (!%p130_p10), %v1342_v17, %v1341_v16  ;;  %v1344_v23 = vld [vmem:[%s2719_s1 + $0x78] sm:$0xff] (!%p130_p10)  ;;  %v1857_v24 = vpack.c.bf16 (!%p130_p10), %v168_v21, %v167_v20  ;;  %v1348_v26 = vld [vmem:[%s2719_s1 + $0x80] sm:$0xff] (!%p130_p10)  ;;  %v1349_v27 = vld [vmem:[%s2719_s1 + $0x88] sm:$0xff] (!%p130_p10) }
  0x14   : > { %v1869_v25 = vpack.c.bf16 (!%p130_p10), %v1344_v23, %v1343_v22  ;;  %v1359_v28 = vld [vmem:[%s2719_s1 + $0xc0] sm:$0xff] (!%p130_p10)  ;;  %v1360_v29 = vld [vmem:[%s2719_s1 + $0xc8] sm:$0xff] (!%p130_p10)  ;;  %v1872_v31 = vpack.c.bf16 (!%p130_p10), %v1349_v27, %v1348_v26  ;;  %v1350_v33 = vld [vmem:[%s2719_s1 + $0x90] sm:$0xff] (!%p130_p10) }
  0x15   : > { %1852 = vmatpush3.bf16.msra.mxu0 (!%p130_p10), %v1851_v12  ;;  %v1884_v32 = vpack.c.bf16 (!%p130_p10), %v1360_v29, %v1359_v28  ;;  %v1351_v34 = vld [vmem:[%s2719_s1 + $0x98] sm:$0xff] (!%p130_p10)  ;;  %v1361_v35 = vld [vmem:[%s2719_s1 + $0xd0] sm:$0xff] (!%p130_p10)  ;;  %v1352_v40 = vld [vmem:[%s2719_s1 + $0xa0] sm:$0xff] (!%p130_p10) }
  0x16   : > { %s152_s25 = scalar_select %p151_p11, %s2116_s12, 1  ;;  %1864 = vmatpush3.bf16.msra.mxu1 %v1863_v13  ;;  %1853 = vmatprep.subr.bf16.mxu0 %v2126_v3  ;;  %v1362_v36 = vld [vmem:[%s2719_s1 + $0xd8] sm:$0xff]  ;;  %v1875_v37 = vpack.c.bf16 %v1351_v34, %v1350_v33  ;;  %v1353_v41 = vld [vmem:[%s2719_s1 + $0xa8] sm:$0xff]  ;;  %v1363_v42 = vld [vmem:[%s2719_s1 + $0xe0] sm:$0xff] }
  0x17   : > { %1865 = vmatprep.subr.bf16.mxu1 %v2126_v3  ;;  %v1887_v39 = vpack.c.bf16 %v1362_v36, %v1361_v35  ;;  %v1364_v43 = vld [vmem:[%s2719_s1 + $0xe8] sm:$0xff]  ;;  %v1878_v44 = vpack.c.bf16 %v1353_v41, %v1352_v40  ;;  %v1354_v47 = vld [vmem:[%s2719_s1 + $0xb0] sm:$0xff]  ;;  %v1355_v48 = vld [vmem:[%s2719_s1 + $0xb8] sm:$0xff]  ;;  %s2129_s12 = smov [#allocation2]  }
  0x18   : > { %s1987_s6 = smul.u32 24, %s152_s25  ;;  %v1890_v45 = vpack.c.bf16 %v1364_v43, %v1363_v42  ;;  %v1365_v49 = vld [vmem:[%s2719_s1 + $0xf0] sm:$0xff]  ;;  %v1366_v50 = vld [vmem:[%s2719_s1 + $0xf8] sm:$0xff]  ;;  %v1881_v51 = vpack.c.bf16 %v1355_v48, %v1354_v47  ;;  %v1370_v53 = vld [vmem:[%s2719_s1 + $0x100] sm:$0xff]  ;;  %s148_s25 = sand.u32 1, %s2108_s10  }
  0x19   : > { %1855 = vmatpush3.bf16.msra.mxu0 %v1854_v18  ;;  %v1893_v52 = vpack.c.bf16 %v1366_v50, %v1365_v49  ;;  %v1371_v54 = vld [vmem:[%s2719_s1 + $0x108] sm:$0xff]  ;;  %v1381_v55 = vld [vmem:[%s2719_s1 + $0x140] sm:$0xff]  ;;  %v1372_v59 = vld [vmem:[%s2719_s1 + $0x110] sm:$0xff]  ;;  %s1332_s26 = sshll.u32 %s148_s25, 3  ;;  %s1243_s5 = scalar_lea.sflag [#allocation3], %s148_s25 }
  0x1a   : > { %1867 = vmatpush3.bf16.msra.mxu1 %v1866_v19  ;;  %1856 = vmatprep.subr.bf16.mxu0 %v2126_v3  ;;  %s2266_s23 = scalar_lea.vmem %s2718_s0, %s1987_s6  ;;  %v1382_v56 = vld [vmem:[%s2719_s1 + $0x148] sm:$0xff]  ;;  %v1896_v57 = vpack.c.bf16 %v1371_v54, %v1370_v53  ;;  %v1373_v60 = vld [vmem:[%s2719_s1 + $0x118] sm:$0xff]  ;;  %v1383_v61 = vld [vmem:[%s2719_s1 + $0x150] sm:$0xff]  ;;  %s150_s28 = scalar_lea.vmem [#allocation2], %s1332_s26 }
  0x1b   : > { %1868 = vmatprep.subr.bf16.mxu1 %v2126_v3  ;;  %v2282_v30 = vld [vmem:[%s2266_s23] sm:$0xff]  ;;  %v2305_v38 = vld [vmem:[%s2266_s23 + $0x8] sm:$0xff]  ;;  %v2328_v46 = vld [vmem:[%s2266_s23 + $0x10] sm:$0x3]  ;;  %v1908_v58 = vpack.c.bf16 %v1382_v56, %v1381_v55  ;;  %v1899_v63 = vpack.c.bf16 %v1373_v60, %v1372_v59  ;;  %s1257_s29 = sshll.u32 %s150_s28, 4  ;;  %s2050_s7 = sshll.u32 %s2129_s12, 4  ;;  %s2673_s29 = int_to_ptr.vmem [resolvable:$true] %s1257_s29  ;;  %s2051_s7 = int_to_ptr.vmem [resolvable:$false] %s2050_s7 }
  0x1c   : > { %v1384_v62 = vld [vmem:[%s2719_s1 + $0x158] sm:$0xff]  ;;  %v1374_v1 = vld [vmem:[%s2719_s1 + $0x120] sm:$0xff]  ;;  %v1375_v2 = vld [vmem:[%s2719_s1 + $0x128] sm:$0xff]  ;;  %s2046_s6 = scalar_lea.vmem %s2673_s29, 128  ;;  %s2052_s8 = scalar_lea.vmem %s2051_s7, 256 }
  0x1d   : > { %1858 = vmatpush3.bf16.msra.mxu0 %v1857_v24  ;;  %v1911_v0 = vpack.c.bf16 %v1384_v62, %v1383_v61  ;;  %v1385_v4 = vld [vmem:[%s2719_s1 + $0x160] sm:$0xff]  ;;  %v1386_v5 = vld [vmem:[%s2719_s1 + $0x168] sm:$0xff]  ;;  %v1902_v6 = vpack.c.bf16 %v1375_v2, %v1374_v1  ;;  %v1376_v8 = vld [vmem:[%s2719_s1 + $0x130] sm:$0xff]  ;;  %p2047_p12 = scmp.ne.s32.totalorder %s2673_s29, %s2046_s6  ;;  %p2053_p1 = scmp.lt.s32.totalorder %s2673_s29, %s2051_s7 }
  0x1e   : > { %1870 = vmatpush3.bf16.msra.mxu1 %v1869_v25  ;;  %1871 = vmatprep.subr.bf16.mxu0 %v2126_v3  ;;  %v1914_v7 = vpack.c.bf16 %v1386_v5, %v1385_v4  ;;  %v1377_v9 = vld [vmem:[%s2719_s1 + $0x138] sm:$0xff]  ;;  %v1387_v10 = vld [vmem:[%s2719_s1 + $0x170] sm:$0xff]  ;;  %v1392_v15 = vld [vmem:[%s2719_s1 + $0x180] sm:$0xff]  ;;  %p2054_p2 = scmp.lt.s32.totalorder %s2052_s8, %s2046_s6 }
  0x1f   : > { %1883 = vmatprep.subr.bf16.mxu1 %v2126_v3  ;;  %v1388_v12 = vld [vmem:[%s2719_s1 + $0x178] sm:$0xff]  ;;  %v1905_v13 = vpack.c.bf16 %v1377_v9, %v1376_v8  ;;  %v1393_v16 = vld [vmem:[%s2719_s1 + $0x188] sm:$0xff]  ;;  %v1403_v17 = vld [vmem:[%s2719_s1 + $0x1c0] sm:$0xff]  ;;  %p2048_p13 = pnand %p2047_p12, %p2185_p4 }
  0x20   : > { %1589 = vmatmul.mubr.msk.f32.vlgmr.msra.gmra.mrb[0].mxu0 %vm169_vm1, %v2282_v30  ;;  %v1917_v14 = vpack.c.bf16 %v1388_v12, %v1387_v10  ;;  %v1404_v18 = vld [vmem:[%s2719_s1 + $0x1c8] sm:$0xff]  ;;  %v1920_v19 = vpack.c.bf16 %v1393_v16, %v1392_v15  ;;  %v1394_v21 = vld [vmem:[%s2719_s1 + $0x190] sm:$0xff]  ;;  %v1395_v22 = vld [vmem:[%s2719_s1 + $0x198] sm:$0xff]  ;;  %p2055_p3 = por %p2054_p2, %p2053_p1 }
  0x21   : > { %1614 = vmatmul.mubr.msk.f32.vlgmr.msra.gmra.mrb[0].mxu1 %vm169_vm1, %v2282_v30  ;;  %1873 = vmatpush3.bf16.msra.mxu0 %v1872_v31  ;;  %v1932_v20 = vpack.c.bf16 %v1404_v18, %v1403_v17  ;;  %v1405_v23 = vld [vmem:[%s2719_s1 + $0x1d0] sm:$0xff]  ;;  %v1406_v24 = vld [vmem:[%s2719_s1 + $0x1d8] sm:$0xff]  ;;  %v1923_v25 = vpack.c.bf16 %v1395_v22, %v1394_v21  ;;  %v1396_v27 = vld [vmem:[%s2719_s1 + $0x1a0] sm:$0xff]  ;;  %p2049_p0 = pneg %p2048_p13 }
  0x22   : > { %1885 = vmatpush3.bf16.msra.mxu1 %v1884_v32  ;;  %1616 = vmatprep.mubr.msk.f32.mxu1 %vm2127_vm0, %v2128_v11  ;;  %v1935_v26 = vpack.c.bf16 %v1406_v24, %v1405_v23  ;;  %v1397_v28 = vld [vmem:[%s2719_s1 + $0x1a8] sm:$0xff]  ;;  %v1407_v29 = vld [vmem:[%s2719_s1 + $0x1e0] sm:$0xff]  ;;  %v1398_v34 = vld [vmem:[%s2719_s1 + $0x1b0] sm:$0xff] }
  0x23   : > { %1874 = vmatprep.subr.bf16.mxu0 %v2126_v3  ;;  %1886 = vmatprep.subr.bf16.mxu1 %v2126_v3  ;;  %v1408_v31 = vld [vmem:[%s2719_s1 + $0x1e8] sm:$0xff]  ;;  %v1926_v32 = vpack.c.bf16 %v1397_v28, %v1396_v27  ;;  %v1399_v35 = vld [vmem:[%s2719_s1 + $0x1b8] sm:$0xff]  ;;  %v1409_v36 = vld [vmem:[%s2719_s1 + $0x1f0] sm:$0xff]  ;;  %p2056_p5 = pnand %p2055_p3, %p2049_p0 }
  0x24   : > { %1591 = vmatprep.mubr.msk.f32.mxu0 %vm2127_vm0, %v2128_v11  ;;  %v1938_v33 = vpack.c.bf16 %v1408_v31, %v1407_v29  ;;  %v1414_v41 = vld [vmem:[%s2719_s1 + $0x200] sm:$0xff]  ;;  %v1415_v42 = vld [vmem:[%s2719_s1 + $0x208] sm:$0xff]  ;;  %v1416_v48 = vld [vmem:[%s2719_s1 + $0x210] sm:$0xff] }
  0x25   : > { %1617 = vmatmul.mubr.msk.f32.gmra.mrb[2].mxu1 %vm169_vm1, %v2305_v38  ;;  %1876 = vmatpush3.bf16.msra.mxu0 %v1875_v37  ;;  %v1410_v37 = vld [vmem:[%s2719_s1 + $0x1f8] sm:$0xff]  ;;  %v1425_v43 = vld [vmem:[%s2719_s1 + $0x240] sm:$0xff]  ;;  %v1427_v50 = vld [vmem:[%s2719_s1 + $0x250] sm:$0xff] }
  0x26   : > { %1888 = vmatpush3.bf16.msra.mxu1 %v1887_v39  ;;  %1592 = vmatmul.mubr.msk.f32.gmra.mrb[2].mxu0 %vm169_vm1, %v2305_v38  ;;  %v1929_v39 = vpack.c.bf16 %v1399_v35, %v1398_v34  ;;  %v1941_v40 = vpack.c.bf16 %v1410_v37, %v1409_v36  ;;  %v1417_v49 = vld [vmem:[%s2719_s1 + $0x218] sm:$0xff]  ;;  %v1418_v54 = vld [vmem:[%s2719_s1 + $0x220] sm:$0xff]  ;;  %v1419_v55 = vld [vmem:[%s2719_s1 + $0x228] sm:$0xff] }
  0x27   : > { %1877 = vmatprep.subr.bf16.mxu0 %v2126_v3  ;;  %1889 = vmatprep.subr.bf16.mxu1 %v2126_v3  ;;  %v1429_v56 = vld [vmem:[%s2719_s1 + $0x260] sm:$0xff]  ;;  %v1420_v60 = vld [vmem:[%s2719_s1 + $0x230] sm:$0xff]  ;;  %v1421_v61 = vld [vmem:[%s2719_s1 + $0x238] sm:$0xff] }
  0x28   : > { %1594 = vmatprep.mubr.msk.f32.mxu0 %vm2127_vm0, %v2128_v11  ;;  %1619 = vmatprep.mubr.msk.f32.mxu1 %vm2127_vm0, %v2128_v11  ;;  %v1431_v62 = vld [vmem:[%s2719_s1 + $0x270] sm:$0xff]  ;;  %v1436_v2 = vld [vmem:[%s2719_s1 + $0x280] sm:$0xff]  ;;  %v1437_v4 = vld [vmem:[%s2719_s1 + $0x288] sm:$0xff] }
  0x29   : > { %1879 = vmatpush3.bf16.msra.mxu0 %v1878_v44  ;;  %1620 = vmatmul.mubr.msk.f32.gmra.mrb[4].mxu1 %vm169_vm1, %v2328_v46  ;;  %v1426_v44 = vld [vmem:[%s2719_s1 + $0x248] sm:$0xff]  ;;  %v1968_v5 = vpack.c.bf16 %v1437_v4, %v1436_v2  ;;  %v1440_v9 = vld [vmem:[%s2719_s1 + $0x2a0] sm:$0xff] }
  0x2a   : > { %1891 = vmatpush3.bf16.msra.mxu1 %v1890_v45  ;;  %1595 = vmatmul.mubr.msk.f32.gmra.mrb[4].mxu0 %vm169_vm1, %v2328_v46  ;;  %v1944_v45 = vpack.c.bf16 %v1415_v42, %v1414_v41  ;;  %v1956_v47 = vpack.c.bf16 %v1426_v44, %v1425_v43  ;;  %v1441_v10 = vld [vmem:[%s2719_s1 + $0x2a8] sm:$0xff] }
  0x2b   : > { %1880 = vmatprep.subr.bf16.mxu0 %v2126_v3  ;;  %1892 = vmatprep.subr.bf16.mxu1 %v2126_v3  ;;  %v1974_v12 = vpack.c.bf16 %v1441_v10, %v1440_v9 }
  0x2c   : > { %1638 = vmatprep.mubr.msk.f32.mxu0 %vm2127_vm0, %v2128_v11  ;;  %1663 = vmatprep.mubr.msk.f32.mxu1 %vm2127_vm0, %v2128_v11 }
  0x2d   : > { %1882 = vmatpush3.bf16.msra.mxu0 %v1881_v51  ;;  %v1428_v51 = vld [vmem:[%s2719_s1 + $0x258] sm:$0xff] }
  0x2e   : > { %1894 = vmatpush3.bf16.msra.mxu1 %v1893_v52  ;;  %1895 = vmatprep.subr.bf16.mxu0 %v2126_v3  ;;  %v1947_v52 = vpack.c.bf16 %v1417_v49, %v1416_v48  ;;  %v1959_v53 = vpack.c.bf16 %v1428_v51, %v1427_v50 }
  0x2f   : > { %1907 = vmatprep.subr.bf16.mxu1 %v2126_v3 }
  0x30   : > { %1639 = vmatmul.mubr.msk.f32.vlgmr.msra.gmra.mrb[6].mxu0 %vm169_vm1, %v2282_v30 }
  0x31   : > { %1664 = vmatmul.mubr.msk.f32.vlgmr.msra.gmra.mrb[6].mxu1 %vm169_vm1, %v2282_v30  ;;  %1897 = vmatpush3.bf16.msra.mxu0 %v1896_v57  ;;  %v1430_v57 = vld [vmem:[%s2719_s1 + $0x268] sm:$0xff] }
  0x32   : > { %1909 = vmatpush3.bf16.msra.mxu1 %v1908_v58  ;;  %1641 = vmatprep.mubr.msk.f32.mxu0 %vm2127_vm0, %v2128_v11  ;;  %v1950_v58 = vpack.c.bf16 %v1419_v55, %v1418_v54  ;;  %v1962_v59 = vpack.c.bf16 %v1430_v57, %v1429_v56 }
  0x33   : > { %1666 = vmatprep.mubr.msk.f32.mxu1 %vm2127_vm0, %v2128_v11  ;;  %1898 = vmatprep.subr.bf16.mxu0 %v2126_v3 }
  0x34   : > { %1642 = vmatmul.mubr.msk.f32.gmra.mrb[8].mxu0 %vm169_vm1, %v2305_v38  ;;  %1910 = vmatprep.subr.bf16.mxu1 %v2126_v3 }
  0x35   : > { %1667 = vmatmul.mubr.msk.f32.gmra.mrb[8].mxu1 %vm169_vm1, %v2305_v38  ;;  %1900 = vmatpush3.bf16.msra.mxu0 %v1899_v63  ;;  %v1432_v63 = vld [vmem:[%s2719_s1 + $0x278] sm:$0xff] }
  0x36   : > { %1912 = vmatpush3.bf16.msra.mxu1 %v1911_v0  ;;  %1901 = vmatprep.subr.bf16.mxu0 %v2126_v3  ;;  %v1953_v0 = vpack.c.bf16 %v1421_v61, %v1420_v60  ;;  %v1965_v1 = vpack.c.bf16 %v1432_v63, %v1431_v62 }
  0x37   : > { %1913 = vmatprep.subr.bf16.mxu1 %v2126_v3  ;;  %1644 = vmatprep.mubr.msk.f32.mxu0 %vm2127_vm0, %v2128_v11 }
  0x38   : > { %1669 = vmatprep.mubr.msk.f32.mxu1 %vm2127_vm0, %v2128_v11  ;;  %1645 = vmatmul.mubr.msk.f32.gmra.mrb[10].mxu0 %vm169_vm1, %v2328_v46 }
  0x39   : > { %1903 = vmatpush3.bf16.msra.mxu0 %v1902_v6  ;;  %1670 = vmatmul.mubr.msk.f32.gmra.mrb[10].mxu1 %vm169_vm1, %v2328_v46  ;;  %v1438_v6 = vld [vmem:[%s2719_s1 + $0x290] sm:$0xff] }
  0x3a   : > { %1915 = vmatpush3.bf16.msra.mxu1 %v1914_v7  ;;  %1904 = vmatprep.subr.bf16.mxu0 %v2126_v3  ;;  %v1439_v7 = vld [vmem:[%s2719_s1 + $0x298] sm:$0xff] }
  0x3b   : > { %1916 = vmatprep.subr.bf16.mxu1 %v2126_v3  ;;  %1688 = vmatprep.mubr.msk.f32.mxu0 %vm2127_vm0, %v2128_v11  ;;  %v1971_v8 = vpack.c.bf16 %v1439_v7, %v1438_v6 }
  0x3c   : > { %1713 = vmatprep.mubr.msk.f32.mxu1 %vm2127_vm0, %v2128_v11 }
  0x3d   : > { %1906 = vmatpush3.bf16.msra.mxu0 %v1905_v13  ;;  %v1442_v13 = vld [vmem:[%s2719_s1 + $0x2b0] sm:$0xff] }
  0x3e   : > { %1918 = vmatpush3.bf16.msra.mxu1 %v1917_v14  ;;  %1919 = vmatprep.subr.bf16.mxu0 %v2126_v3  ;;  %v1443_v14 = vld [vmem:[%s2719_s1 + $0x2b8] sm:$0xff] }
  0x3f   : > { %1931 = vmatprep.subr.bf16.mxu1 %v2126_v3  ;;  %v1977_v15 = vpack.c.bf16 %v1443_v14, %v1442_v13 }
  0x40   : > { %1689 = vmatmul.mubr.msk.f32.vlgmr.msra.gmra.mrb[12].mxu0 %vm169_vm1, %v2282_v30 }
  0x41   : > { %1714 = vmatmul.mubr.msk.f32.vlgmr.msra.gmra.mrb[12].mxu1 %vm169_vm1, %v2282_v30  ;;  %1921 = vmatpush3.bf16.msra.mxu0 %v1920_v19 }
  0x42   : > { %1933 = vmatpush3.bf16.msra.mxu1 %v1932_v20  ;;  %1691 = vmatprep.mubr.msk.f32.mxu0 %vm2127_vm0, %v2128_v11 }
  0x43   : > { %1716 = vmatprep.mubr.msk.f32.mxu1 %vm2127_vm0, %v2128_v11  ;;  %1922 = vmatprep.subr.bf16.mxu0 %v2126_v3 }
  0x44   : > { %1692 = vmatmul.mubr.msk.f32.gmra.mrb[14].mxu0 %vm169_vm1, %v2305_v38  ;;  %1934 = vmatprep.subr.bf16.mxu1 %v2126_v3 }
  0x45   : > { %1717 = vmatmul.mubr.msk.f32.gmra.mrb[14].mxu1 %vm169_vm1, %v2305_v38  ;;  %1924 = vmatpush3.bf16.msra.mxu0 %v1923_v25 }
  0x46   : > { %1936 = vmatpush3.bf16.msra.mxu1 %v1935_v26  ;;  %1925 = vmatprep.subr.bf16.mxu0 %v2126_v3 }
  0x47   : > { %1937 = vmatprep.subr.bf16.mxu1 %v2126_v3  ;;  %1694 = vmatprep.mubr.msk.f32.mxu0 %vm2127_vm0, %v2128_v11 }
  0x48   : > { %1719 = vmatprep.mubr.msk.f32.mxu1 %vm2127_vm0, %v2128_v11  ;;  %1695 = vmatmul.mubr.msk.f32.gmra.mrb[16].mxu0 %vm169_vm1, %v2328_v46 }
  0x49   : > { %1927 = vmatpush3.bf16.msra.mxu0 %v1926_v32  ;;  %1720 = vmatmul.mubr.msk.f32.gmra.mrb[16].mxu1 %vm169_vm1, %v2328_v46 }
  0x4a   : > { %1939 = vmatpush3.bf16.msra.mxu1 %v1938_v33  ;;  %1928 = vmatprep.subr.bf16.mxu0 %v2126_v3 }
  0x4b   : > { %1940 = vmatprep.subr.bf16.mxu1 %v2126_v3  ;;  %1738 = vmatprep.mubr.msk.f32.mxu0 %vm2127_vm0, %v2128_v11 }
  0x4c   : > { %1763 = vmatprep.mubr.msk.f32.mxu1 %vm2127_vm0, %v2128_v11 }
  0x4d   : > { %1930 = vmatpush3.bf16.msra.mxu0 %v1929_v39 }
  0x4e   : > { %1942 = vmatpush3.bf16.msra.mxu1 %v1941_v40  ;;  %1943 = vmatprep.subr.bf16.mxu0 %v2126_v3 }
  0x4f   : > { %1955 = vmatprep.subr.bf16.mxu1 %v2126_v3 }
  0x50   : > { %1739 = vmatmul.mubr.msk.f32.vlgmr.msra.gmra.mrb[18].mxu0 %vm169_vm1, %v2282_v30 }
  0x51   : > { %1764 = vmatmul.mubr.msk.f32.vlgmr.msra.gmra.mrb[18].mxu1 %vm169_vm1, %v2282_v30  ;;  %1945 = vmatpush3.bf16.msra.mxu0 %v1944_v45 }
  0x52   : > { %1957 = vmatpush3.bf16.msra.mxu1 %v1956_v47  ;;  %1741 = vmatprep.mubr.msk.f32.mxu0 %vm2127_vm0, %v2128_v11 }
  0x53   : > { %1766 = vmatprep.mubr.msk.f32.mxu1 %vm2127_vm0, %v2128_v11  ;;  %1946 = vmatprep.subr.bf16.mxu0 %v2126_v3 }
  0x54   : > { %1742 = vmatmul.mubr.msk.f32.gmra.mrb[20].mxu0 %vm169_vm1, %v2305_v38  ;;  %1958 = vmatprep.subr.bf16.mxu1 %v2126_v3 }
  0x55   : > { %1767 = vmatmul.mubr.msk.f32.gmra.mrb[20].mxu1 %vm169_vm1, %v2305_v38  ;;  %1948 = vmatpush3.bf16.msra.mxu0 %v1947_v52 }
  0x56   : > { %1960 = vmatpush3.bf16.msra.mxu1 %v1959_v53  ;;  %1949 = vmatprep.subr.bf16.mxu0 %v2126_v3 }
  0x57   : > { %1961 = vmatprep.subr.bf16.mxu1 %v2126_v3  ;;  %1744 = vmatprep.mubr.msk.f32.mxu0 %vm2127_vm0, %v2128_v11 }
  0x58   : > { %1769 = vmatprep.mubr.msk.f32.mxu1 %vm2127_vm0, %v2128_v11  ;;  %1745 = vmatmul.mubr.msk.f32.gmra.mrb[22].mxu0 %vm169_vm1, %v2328_v46 }
  0x59   : > { %1951 = vmatpush3.bf16.msra.mxu0 %v1950_v58  ;;  %1770 = vmatmul.mubr.msk.f32.gmra.mrb[22].mxu1 %vm169_vm1, %v2328_v46 }
  0x5a   : > { %1963 = vmatpush3.bf16.msra.mxu1 %v1962_v59  ;;  %1952 = vmatprep.subr.bf16.mxu0 %v2126_v3 }
  0x5b   : > { %1964 = vmatprep.subr.bf16.mxu1 %v2126_v3  ;;  %1788 = vmatprep.mubr.msk.f32.mxu0 %vm2127_vm0, %v2128_v11 }
  0x5c   : > { %1813 = vmatprep.mubr.msk.f32.mxu1 %vm2127_vm0, %v2128_v11 }
  0x5d   : > { %1954 = vmatpush3.bf16.msra.mxu0 %v1953_v0 }
  0x5e   : > { %1966 = vmatpush3.bf16.msra.mxu1 %v1965_v1  ;;  %1967 = vmatprep.subr.bf16.mxu0 %v2126_v3 }
  0x5f   : > { %1979 = vmatprep.subr.bf16.mxu1 %v2126_v3 }
  0x60   : > { %1789 = vmatmul.mubr.msk.f32.vlgmr.msra.gmra.mrb[24].mxu0 %vm169_vm1, %v2282_v30 }
  0x61   : > { %1814 = vmatmul.mubr.msk.f32.vlgmr.msra.gmra.mrb[24].mxu1 %vm169_vm1, %v2282_v30  ;;  %1791 = vmatprep.mubr.msk.f32.mxu0 %vm2127_vm0, %v2128_v11 }
  0x62   : > { %1983 = vmatpush3.bf16.msra.mxu1 %v1968_v5  ;;  %1816 = vmatprep.mubr.msk.f32.mxu1 %vm2127_vm0, %v2128_v11 }
  0x63   : > { %1980 = vmatprep.subr.bf16.mxu1 %v2126_v3  ;;  %1969 = vmatpush3.bf16.msra.mxu0 %v1968_v5 }
  0x64   : > { %1792 = vmatmul.mubr.msk.f32.gmra.mrb[26].mxu0 %vm169_vm1, %v2305_v38  ;;  %1970 = vmatprep.subr.bf16.mxu0 %v2126_v3 }
  0x65   : > { %1817 = vmatmul.mubr.msk.f32.gmra.mrb[26].mxu1 %vm169_vm1, %v2305_v38  ;;  %1794 = vmatprep.mubr.msk.f32.mxu0 %vm2127_vm0, %v2128_v11 }
  0x66   : > { %1984 = vmatpush3.bf16.msra.mxu1 %v1971_v8  ;;  %1819 = vmatprep.mubr.msk.f32.mxu1 %vm2127_vm0, %v2128_v11 }
  0x67   : > { %1981 = vmatprep.subr.bf16.mxu1 %v2126_v3  ;;  %1972 = vmatpush3.bf16.msra.mxu0 %v1971_v8 }
  0x68   : > { %1973 = vmatprep.subr.bf16.mxu0 %v2126_v3  ;;  %1795 = vmatmul.mubr.msk.f32.gmra.mrb[28].mxu0 %vm169_vm1, %v2328_v46 }
  0x69   : > { %1820 = vmatmul.mubr.msk.f32.gmra.mrb[28].mxu1 %vm169_vm1, %v2328_v46  ;;  %1838 = vmatprep.mubr.msk.f32.mxu0 %vm2127_vm0, %v2128_v11 }
  0x6a   : > { %1985 = vmatpush3.bf16.msra.mxu1 %v1974_v12  ;;  %1841 = vmatprep.mubr.msk.f32.mxu1 %vm2127_vm0, %v2128_v11 }
  0x6b   : > { %1982 = vmatprep.subr.bf16.mxu1 %v2126_v3  ;;  %1975 = vmatpush3.bf16.msra.mxu0 %v1974_v12 }
  0x6c   : > { %1976 = vmatprep.subr.bf16.mxu0 %v2126_v3 }
  0x6e   : > { %1986 = vmatpush3.bf16.msra.mxu1 %v1977_v15 }
  0x6f   : > { %1978 = vmatpush3.bf16.msra.mxu0 %v1977_v15 }
  0x71   : > { %1842 = vmatmul.mubr.msk.f32.vlgmr.msra.gmra.mrb[30].mxu1 %vm169_vm1, %v2305_v38 }
  0x72   : > { %1844 = vmatprep.mubr.msk.f32.mxu1 %vm2127_vm0, %v2128_v11  ;;  %1839 = vmatmul.mubr.msk.f32.vlgmr.msra.gmra.mrb[30].mxu0 %vm169_vm1, %v2282_v30 }
  0x75   : > { %1845 = vmatmul.mubr.msk.f32.gmra.mrb[32].mxu1 %vm169_vm1, %v2328_v46 }
  0xf3   : > { %v245_v16 = vpop.f32.mrb[0].mxu0 }
  0xf4   : > { %v333_v17 = vpop.f32.mrb[0].mxu1  ;;  %v1590_v18 = vpop.f32.mrb[1].mxu0 }
  0xf5   : > { %v1615_v19 = vpop.f32.mrb[1].mxu1  ;;  %v349_v3 = vrot.slane %v333_v17, 1 }
  0xf8   : > { %v338_v20 = vpop.f32.mrb[2].mxu1 }
  0xf9   : > { %v350_v21 = vrot.slane %v338_v20, 1  ;;  %v1618_v22 = vpop.f32.mrb[3].mxu1  ;;  %v250_v23 = vpop.f32.mrb[2].mxu0 }
  0xfa   : > { %v1593_v38 = vpop.f32.mrb[3].mxu0 }
  0xfb   : > { %v351_v24 = vsel %vm348_vm2, %v349_v3, %v350_v21 }
  0xfc   : > { %v353_v11 = vadd.f32 %v351_v24, %v245_v16  ;;  %v343_v25 = vpop.f32.mrb[4].mxu1 }
  0xfd   : > { %v1621_v26 = vpop.f32.mrb[5].mxu1  ;;  %v254_v30 = vpop.f32.mrb[4].mxu0 }
  0xfe   : > { %v1596_v27 = vpop.f32.mrb[5].mxu0 }
 0x103   : > { %v429_v28 = vpop.f32.mrb[6].mxu0 }
 0x104   : > { %v525_v46 = vpop.f32.mrb[6].mxu1  ;;  %v1640_v29 = vpop.f32.mrb[7].mxu0  ;;  %v445_v32 = vrot.slane %v429_v28, 2 }
 0x105   : > { %v1665_v31 = vpop.f32.mrb[7].mxu1  ;;  %v541_v37 = vrot.slane %v525_v46, 3 }
 0x107   : > { %v434_v33 = vpop.f32.mrb[8].mxu0 }
 0x108   : > { %v446_v34 = vrot.slane %v434_v33, 2  ;;  %v530_v35 = vpop.f32.mrb[8].mxu1  ;;  %v1643_v36 = vpop.f32.mrb[9].mxu0 }
 0x109   : > { %v542_v39 = vrot.slane %v530_v35, 3  ;;  %v1668_v40 = vpop.f32.mrb[9].mxu1 }
 0x10a   : > { %v447_v41 = vsel %vm444_vm3, %v445_v32, %v446_v34 }
 0x10b   : > { %v543_v42 = vsel %vm540_vm4, %v541_v37, %v542_v39  ;;  %v439_v43 = vpop.f32.mrb[10].mxu0  ;;  %v449_v44 = vadd.f32 %v447_v41, %v353_v11 }
 0x10c   : > { %v535_v45 = vpop.f32.mrb[10].mxu1  ;;  %v1646_v47 = vpop.f32.mrb[11].mxu0 }
 0x10d   : > { %v1671_v48 = vpop.f32.mrb[11].mxu1  ;;  %v545_v49 = vadd.f32 %v543_v42, %v449_v44 }
 0x113   : > { %v621_v50 = vpop.f32.mrb[12].mxu0 }
 0x114   : > { %v717_v51 = vpop.f32.mrb[12].mxu1  ;;  %v1690_v52 = vpop.f32.mrb[13].mxu0  ;;  %v637_v54 = vrot.slane %v621_v50, 4 }
 0x115   : > { %v1715_v53 = vpop.f32.mrb[13].mxu1  ;;  %v733_v59 = vrot.slane %v717_v51, 5 }
 0x117   : > { %v626_v55 = vpop.f32.mrb[14].mxu0 }
 0x118   : > { %v638_v56 = vrot.slane %v626_v55, 4  ;;  %v722_v57 = vpop.f32.mrb[14].mxu1  ;;  %v1693_v58 = vpop.f32.mrb[15].mxu0 }
 0x119   : > { %v734_v60 = vrot.slane %v722_v57, 5  ;;  %v1718_v61 = vpop.f32.mrb[15].mxu1 }
 0x11a   : > { %v639_v62 = vsel %vm636_vm5, %v637_v54, %v638_v56 }
 0x11b   : > { %v735_v63 = vsel %vm732_vm6, %v733_v59, %v734_v60  ;;  %v631_v0 = vpop.f32.mrb[16].mxu0  ;;  %v641_v1 = vadd.f32 %v639_v62, %v545_v49 }
 0x11c   : > { %v727_v2 = vpop.f32.mrb[16].mxu1  ;;  %v1696_v4 = vpop.f32.mrb[17].mxu0 }
 0x11d   : > { %v1721_v5 = vpop.f32.mrb[17].mxu1  ;;  %v737_v6 = vadd.f32 %v735_v63, %v641_v1 }
 0x123   : > { %v813_v7 = vpop.f32.mrb[18].mxu0 }
 0x124   : > { %v909_v8 = vpop.f32.mrb[18].mxu1  ;;  %v1740_v9 = vpop.f32.mrb[19].mxu0  ;;  %v829_v12 = vrot.slane %v813_v7, 6 }
 0x125   : > { %v1765_v10 = vpop.f32.mrb[19].mxu1  ;;  %v925_v17 = vrot.slane %v909_v8, 7 }
 0x127   : > { %v818_v13 = vpop.f32.mrb[20].mxu0 }
 0x128   : > { %v830_v14 = vrot.slane %v818_v13, 6  ;;  %v914_v15 = vpop.f32.mrb[20].mxu1  ;;  %v1743_v16 = vpop.f32.mrb[21].mxu0 }
 0x129   : > { %v926_v18 = vrot.slane %v914_v15, 7  ;;  %v1768_v19 = vpop.f32.mrb[21].mxu1 }
 0x12a   : > { %v831_v20 = vsel %vm828_vm7, %v829_v12, %v830_v14 }
 0x12b   : > { %v823_v3 = vpop.f32.mrb[22].mxu0  ;;  %v833_v21 = vadd.f32 %v831_v20, %v737_v6  ;;  %v927_v22 = vsel %vm924_vm8, %v925_v17, %v926_v18 }
 0x12c   : > { %v919_v23 = vpop.f32.mrb[22].mxu1  ;;  %v1746_v38 = vpop.f32.mrb[23].mxu0 }
 0x12d   : > { %v1771_v24 = vpop.f32.mrb[23].mxu1  ;;  %v929_v11 = vadd.f32 %v927_v22, %v833_v21 }
 0x133   : > { %v1005_v25 = vpop.f32.mrb[24].mxu0 }
 0x134   : > { %v1093_v26 = vpop.f32.mrb[24].mxu1  ;;  %v1790_v30 = vpop.f32.mrb[25].mxu0 }
 0x135   : > { %v1815_v27 = vpop.f32.mrb[25].mxu1 }
 0x137   : > { %v1009_v28 = vpop.f32.mrb[26].mxu0 }
 0x138   : > { %v1017_v46 = vadd.f32 %v1009_v28, %v929_v11  ;;  %v1097_v29 = vpop.f32.mrb[26].mxu1  ;;  %v1793_v31 = vpop.f32.mrb[27].mxu0 }
 0x139   : > { %v1818_v32 = vpop.f32.mrb[27].mxu1  ;;  %v1108_v33 = vrot.slane %v1097_v29, 1 }
 0x13b   : > { %v1014_v34 = vpop.f32.mrb[28].mxu0 }
 0x13c   : > { %v1102_v35 = vpop.f32.mrb[28].mxu1  ;;  %v1796_v36 = vpop.f32.mrb[29].mxu0 }
 0x13d   : > { %v1109_v37 = vrot.slane %v1102_v35, 1  ;;  %v1821_v39 = vpop.f32.mrb[29].mxu1 }
 0x13f   : > { %v1110_v40 = vsel %vm348_vm2, %v1108_v33, %v1109_v37 }
 0x140   : > { %v1112_v41 = vadd.f32 %v1110_v40, %v1017_v46 }
 0x144   : > { %v1192_v42 = vpop.f32.mrb[30].mxu1 }
 0x145   : > { %v1843_v43 = vpop.f32.mrb[31].mxu1  ;;  %v1188_v44 = vpop.f32.mrb[30].mxu0  ;;  %v1203_v48 = vrot.slane %v1192_v42, 2 }
 0x146   : > { %v1840_v45 = vpop.f32.mrb[31].mxu0 }
 0x148   : > { %v1197_v47 = vpop.f32.mrb[32].mxu1 }
 0x149   : > { %v1204_v49 = vrot.slane %v1197_v47, 2  ;;  %v1846_v50 = vpop.f32.mrb[33].mxu1 }
 0x14b   : > { %v1205_v51 = vsel %vm444_vm3, %v1203_v48, %v1204_v49 }
 0x14c   : > { %v1207_v52 = vadd.f32 %v1205_v51, %v1112_v41 }
 0x14e   : > { %1208 = vxpose.xlu0.b32.start.end [1/1] (short) (narrow) %v1207_v52, 8 }
 0x1ce   : > { %v1224_v53 = vpop.trf.xlu0 }
 0x1cf   : > { %1241 = vst.msk [vmem:[%s150_s28] sm:$0xff] %vm1240_vm9, %v1224_v53 }
 0x1d0   : > { %2059 = shalt.err (!%p2056_p5)
}
 0x1d1   : > { %s2060_s15 = scalar_lea.hbm %s2671_s4, 128  ;;  %s2064_s18 = scalar_lea.hbm %s2720_s2, 256 }
 0x1d2   : > { %p2061_p6 = scmp.ne.s32.totalorder %s2671_s4, %s2060_s15  ;;  %p2065_p10 = scmp.lt.u32.totalorder %s2671_s4, %s2720_s2 }
 0x1d3   : > { %p2066_p11 = scmp.lt.u32.totalorder %s2064_s18, %s2060_s15  ;;  %p2068_p13 = scmp.lt.u32.totalorder %s2060_s15, %s2671_s4 }
 0x1d4   : > { %p2062_p7 = pnand %p2061_p6, %p2185_p4 }
 0x1d5   : > { %p2067_p12 = por %p2066_p11, %p2065_p10 }
 0x1d6   : > { %p2063_p9 = pneg %p2062_p7 }
 0x1d7   : > { %p2069_p0 = por %p2068_p13, %p2067_p12 }
 0x1d9   : > { %p2070_p1 = pnand %p2069_p0, %p2063_p9 }
 0x1db   : > { %2073 = shalt.err (!%p2070_p1)
}
 0x1dc   : > { %1988 = dma.vmem_to_hbm [thread:$0]  (%p2185_p4), %s2673_s29, 128, %s2671_s4, %s1243_s5  }
 0x1dd PF: > { %p1994_p2 = scmp.ge.s32.totalorder %s2124_s14, 2  ;;  %s1269_s25 = sand.u32 1, %s2104_s9  }
 0x1de   : > { %s1270_s26 = scalar_lea.sflag [#allocation3], %s1269_s25 }
 0x1df   : > { %p1991_p3 = pnand %p1994_p2, %p2192_p8 }
 0x1e1   : > { %2099 = dma.done.wait (!%p1991_p3), %s1270_s26, 128  }
 0x1e2   : > { %2101 = vsyncadd (!%p1991_p3), %s1270_s26, 4294967168  ;;  %s15_s14 = sadd.s32 1, %s2124_s14   ;;  %s2723_s9 = smov %s2108_s10 }
 0x1e3   : > { %p12_p5 = scmp.ge.s32.totalorder %s15_s14, 4   ;;  %s2724_s10 = smov %s2112_s11 }
 0x1e4   : > { %s2725_s11 = smov %s2198_s22  ;;  %s2726_s12 = smov %s2120_s13 }
 0x1e5   : > { %s2727_s13 = smov %s2729_s17  ;;  %14 = sbr.rel (!%p12_p5) target bundleno = 4 (0x4), region = 74 }
 0x1ec   :  { %1275 = vsyncpa [#allocation3], 1 }
 0x1ed   :  { %1277 = vsyncpa [#allocation3 + $0x1], 1 }

</bundles_post_ra>
